<compile_context>
chip_gen: v6e
topology: v6e:2x2x1
jax: 0.10.0
libtpu: 0.0.40
codegen_flags: <defaults>
</compile_context>

<pallas_src>
import jax
import jax.numpy as jnp
from jax.experimental import pallas as pl
from jax.experimental.pallas import tpu as pltpu


def _copy_kernel(x_ref, o_ref):
    # Pure pass-through: the reshape itself is a metadata operation.
    o_ref[...] = x_ref[...]


def _sublane_multiple(dtype):
    itemsize = jnp.dtype(dtype).itemsize
    if itemsize >= 4:
        return 8          # f32 / i32
    if itemsize == 2:
        return 16         # bf16 / f16
    return 32             # int8 / fp8


def _choose_slab(n_elems, sublane):
    """Pick a lane/sublane-dense 2-D factoring (rows, cols) of the flat buffer."""
    lane_dense_only = None
    for cols in (1024, 512, 256, 128):        # prefer wide, lane-dense last dim
        if n_elems % cols:
            continue
        rows = n_elems // cols
        if rows % sublane == 0:
            return rows, cols                 # dense in both lane and sublane
        if lane_dense_only is None:
            lane_dense_only = (rows, cols)
    if lane_dense_only is not None:
        return lane_dense_only
    return 1, n_elems                          # fallback: single full-array block


def _choose_row_tile(rows, cols, itemsize, sublane, max_tile_bytes=4 * 1024 * 1024):
    """Row tile: multiple of the sublane packing, <= ~4 MiB per block.

    4 MiB keeps double-buffered input + output (~16 MiB in flight) under the
    default scoped-VMEM limit even on v7x (64 MiB VMEM / 32 MiB scoped).
    """
    if rows % sublane:
        return rows                            # block == full dim (always legal)
    cap = max(sublane, max_tile_bytes // max(1, cols * itemsize))
    t = (min(rows, cap) // sublane) * sublane
    while t >= sublane:
        if rows % t == 0:
            return t
        t -= sublane
    return rows


def reshape_pallas(x, c, h, w):
    """Equivalent of reshape(c, h, w).forward(x) == x.view(B, c, h, w)."""
    b = x.shape[0]
    total = 1
    for d in x.shape[1:]:
        total *= d
    assert total == c * h * w, "element count must match target (c, h, w)"

    n_elems = b * total
    sublane = _sublane_multiple(x.dtype)
    itemsize = jnp.dtype(x.dtype).itemsize

    rows, cols = _choose_slab(n_elems, sublane)
    row_tile = _choose_row_tile(rows, cols, itemsize, sublane)
    grid = (rows // row_tile,)

    # Flatten to a lane/sublane-dense slab in row-major order — identical
    # element order to torch .view on a contiguous tensor.
    x2d = jnp.reshape(x, (rows, cols))

    out2d = pl.pallas_call(
        _copy_kernel,
        out_shape=jax.ShapeDtypeStruct((rows, cols), x.dtype),
        grid=grid,
        in_specs=[pl.BlockSpec((row_tile, cols), lambda i: (i, 0))],
        out_specs=pl.BlockSpec((row_tile, cols), lambda i: (i, 0)),
        # Let XLA reuse the input HBM buffer for the output (no fresh
        # allocation; halves write-side traffic when the input is donatable).
        input_output_aliases={0: 0},
        compiler_params=pltpu.CompilerParams(
            dimension_semantics=("parallel",),
        ),
    )(x2d)

    # Final metadata reshape to the target (B, c, h, w).
    return jnp.reshape(out2d, (b, c, h, w))


if __name__ == "__main__":
    key = jax.random.PRNGKey(0)
    # Small shapes: batch=2, channels=4, spatial=16x16.
    B, C, H, W = 2, 4, 16, 16
    # Input shaped like a flattened feature map that the module re-views as NCHW.
    x = jax.random.normal(key, (B, C * H * W), dtype=jnp.float32)

    y = reshape_pallas(x, C, H, W)
    y = jax.block_until_ready(y)

    # Correctness check against plain reshape (== torch .view on contiguous tensor).
    ref = jnp.reshape(x, (B, C, H, W))
    assert y.shape == (B, C, H, W)
    assert y.dtype == x.dtype
    assert bool(jnp.array_equal(y, ref))

    print("KERNEL_OK")
</pallas_src>

<mosaic_0001>
module attributes {stable_mosaic.version = 11 : i64} {
  func.func @_copy_kernel(%arg0: i32, %arg1: memref<8x256xf32, #tpu.memory_space<vmem>>, %arg2: memref<8x256xf32, #tpu.memory_space<vmem>>) attributes {dimension_semantics = [#tpu.dimension_semantics<parallel>], iteration_bounds = array<i64: 1>, scalar_prefetch = 0 : i64, scratch_operands = 0 : i64, tpu.core_type = #tpu.core_type<tc>, window_params = [{transform_indices = @transform_0, window_bounds = array<i64: 8, 256>}, {transform_indices = @transform_1, window_bounds = array<i64: 8, 256>}]} {
    %c0 = arith.constant 0 : index
    %c0_0 = arith.constant 0 : index
    %0 = vector.load %arg1[%c0, %c0_0] : memref<8x256xf32, #tpu.memory_space<vmem>>, vector<8x256xf32>
    %c0_1 = arith.constant 0 : index
    %c0_2 = arith.constant 0 : index
    %1 = vector.load %arg2[%c0_1, %c0_2] : memref<8x256xf32, #tpu.memory_space<vmem>>, vector<8x256xf32>
    tpu.vector_store %arg2[%c0_1, %c0_2], %0 {strides = array<i32>} : memref<8x256xf32, #tpu.memory_space<vmem>>, vector<8x256xf32>,
    return
  }
  func.func @transform_0(%arg0: i32) -> (i32, i32) {
    %c0_i32 = arith.constant 0 : i32
    %c0_i32_0 = arith.constant 0 : i32
    return %arg0, %c0_i32 : i32, i32
  }
  func.func @transform_1(%arg0: i32) -> (i32, i32) {
    %c0_i32 = arith.constant 0 : i32
    %c0_i32_0 = arith.constant 0 : i32
    return %arg0, %c0_i32 : i32, i32
  }
}

</mosaic_0001>

<bundles_post_ra>
// kernel: tpu_custom_call.1
= control target key start
LH: loop header
LB: loop body
LE: loop exit
PB: predicated region body
PF: predicated region fallthrough
CT: control target
= control target key end

     0   :  { %6 = vsyncpa [#allocation3], 0  ;;  %s104_s0 = inlined_call_operand.hbm [shape: f32[8,256], index: 0, kind: input, shape index: {}, may-alias: {0,1}]   ;;  %s105_s1 = inlined_call_operand.hbm [shape: f32[8,256], index: 1, kind: output, shape index: {}, may-alias: {0,1}]  }
   0x1   :  { %7 = vsyncpa [#allocation4], 0  ;;  %s86_s6 = smov [#allocation2]  }
   0x2   :  { %s14_s7 = sshll.u32 %s86_s6, 4  ;;  %s15_s7 = int_to_ptr.vmem [resolvable:$true] %s14_s7 }
   0x3   :  { %s50_s8 = scalar_lea.vmem %s15_s7, 256  ;;  %p55_p1 = scmp.lt.s32.totalorder %s15_s7, %s15_s7 }
   0x4   :  { %p51_p0 = scmp.ne.s32.totalorder %s15_s7, %s50_s8  ;;  %p56_p2 = scmp.lt.s32.totalorder %s50_s8, %s50_s8 }
   0x6   :  { %p57_p3 = por %p56_p2, %p55_p1 }
   0x8   :  { %p58_p4 = pnand %p57_p3, %p51_p0 }
   0xa   :  { %61 = shalt.err (!%p58_p4)
}
   0xb   :  { %17 = dma.hbm_to_vmem [thread:$0]  %s104_s0, 256, %s15_s7, [#allocation3]  }
   0xc   :  { %82 = dma.done.wait [#allocation3], 256  }
   0xd   :  { %83 = vsyncadd [#allocation3], 4294967040  ;;  %s87_s11 = smov [#allocation5]   ;;  %v21_v0 = vld [vmem:[#allocation2] sm:$0xff]  ;;  %v22_v1 = vld [vmem:[#allocation2 + $0x8] sm:$0xff] }
   0xe   :  { %s31_s12 = sshll.u32 %s87_s11, 4  ;;  %23 = vst [vmem:[#allocation5] sm:$0xff] %v21_v0  ;;  %24 = vst [vmem:[#allocation5 + $0x8] sm:$0xff] %v22_v1  ;;  %s32_s12 = int_to_ptr.vmem [resolvable:$true] %s31_s12 }
   0xf   :  { %s62_s13 = scalar_lea.vmem %s32_s12, 256  ;;  %p67_p6 = scmp.lt.s32.totalorder %s32_s12, %s32_s12 }
  0x10   :  { %p63_p5 = scmp.ne.s32.totalorder %s32_s12, %s62_s13  ;;  %p68_p7 = scmp.lt.s32.totalorder %s62_s13, %s62_s13 }
  0x12   :  { %p69_p8 = por %p68_p7, %p67_p6 }
  0x14   :  { %p70_p9 = pnand %p69_p8, %p63_p5 }
  0x16   :  { %73 = shalt.err (!%p70_p9)
}
  0x17   :  { %34 = dma.vmem_to_hbm [thread:$0]  %s32_s12, 256, %s105_s1, [#allocation4]  }
  0x18   :  { %84 = dma.done.wait [#allocation4], 256  }
  0x19   :  { %85 = vsyncadd [#allocation4], 4294967040 }
  0x1a   :  { %38 = vsyncpa [#allocation3], 1 }
  0x1b   :  { %39 = vsyncpa [#allocation4], 1 }

</bundles_post_ra>
